<compile_context>
chip_gen: v7x
topology: tpu7x:2x2x1
jax: 0.10.0
libtpu: 0.0.40
codegen_flags: <defaults>
</compile_context>

<pallas_src>
import functools

import jax
import jax.numpy as jnp
import numpy as np
from jax.experimental import pallas as pl
from jax.experimental.pallas import tpu as pltpu


def _fa_att_partial_kernel(x_ref, f_ref, wx_ref, bx_ref, wf_ref, bf_ref,
                           att_ref, acc_ref, *, tiles_per_split, tile_hw,
                           hw_valid, masked):
    """Pass 1: accumulate partial (Cx, Cx) attention logits over HW tiles.

    x_ref  : (1, Cx, T) bf16   input to conv_x1 (inter_channels wide)
    f_ref  : (1, Cf, T) bf16   input to conv_f1 (in_ch wide)
    w*_ref : (Cout, Cin) bf16  folded conv+BN weights
    b*_ref : (Cout, 1)  f32    folded BN biases
    att_ref: (1, 1, Cx, Cx) f32  partial logits for this (batch, HW-split)
    acc_ref: (Cx, Cx)   f32    VMEM accumulator (resident across the t axis)
    """
    s = pl.program_id(1)
    t = pl.program_id(2)

    @pl.when(t == 0)
    def _():
        acc_ref[...] = jnp.zeros_like(acc_ref)

    x = x_ref[0]          # (Cx, T)
    f = f_ref[0]          # (Cf, T)

    # conv_x1 / conv_f1: folded 1x1 conv + BN + ReLU  (W @ act + b)
    feat_x = jnp.maximum(
        jnp.dot(wx_ref[...], x, preferred_element_type=jnp.float32)
        + bx_ref[...], 0.0)
    feat_f = jnp.maximum(
        jnp.dot(wf_ref[...], f, preferred_element_type=jnp.float32)
        + bf_ref[...], 0.0)

    if masked:
        # Tail mask: padded HW columns become relu(bias) != 0 after the folded
        # conv, so they must be zeroed before entering the HW reduction.
        col = (jax.lax.broadcasted_iota(jnp.int32, (1, tile_hw), 1)
               + (s * tiles_per_split + t) * tile_hw)
        valid = col < hw_valid
        feat_x = jnp.where(valid, feat_x, 0.0)
        feat_f = jnp.where(valid, feat_f, 0.0)

    # attention[c1, c2] += sum_hw feat_x[c1, hw] * feat_f[c2, hw]
    acc_ref[...] += jax.lax.dot_general(
        feat_x.astype(jnp.bfloat16), feat_f.astype(jnp.bfloat16),
        (((1,), (1,)), ((), ())), preferred_element_type=jnp.float32)

    @pl.when(t == pl.num_programs(2) - 1)
    def _():
        att_ref[0, 0] = acc_ref[...]


def _fa_apply_kernel(x_ref, att_ref, wx_ref, bx_ref, wp_ref, bp_ref, o_ref):
    """Pass 2: recompute conv_x1 tile, apply (alpha-folded) attention, conv_p2.

    x_ref   : (1, Cx, T)  bf16
    att_ref : (1, Cx, Cx) bf16   alpha * softmax(max - att) from pass-1 epilogue
    o_ref   : (1, Cx, T)  bf16
    """
    x = x_ref[0]                                     # (Cx, T)
    feat_x = jnp.maximum(
        jnp.dot(wx_ref[...], x, preferred_element_type=jnp.float32)
        + bx_ref[...], 0.0)

    # feat_e[c, hw] = sum_c' (alpha * att_sm)[c, c'] * feat_x[c', hw]
    feat_e = jnp.dot(att_ref[0], feat_x.astype(jnp.bfloat16),
                     preferred_element_type=jnp.float32)

    feat_p = feat_e + feat_x      # alpha already folded into att weights

    # conv_p2: folded 1x1 conv + BN + ReLU
    out = jnp.maximum(
        jnp.dot(wp_ref[...], feat_p.astype(jnp.bfloat16),
                preferred_element_type=jnp.float32)
        + bp_ref[...], 0.0)
    o_ref[0] = out.astype(o_ref.dtype)


def _pick_hw_tile(hw, target):
    """Pick HW tile (multiple of 128) <= target.

    Returns (T, needs_pad): prefers a divisor of hw; otherwise pads hw up to a
    multiple of T and masks the tail inside pass 1.
    """
    target = max(128, (target // 128) * 128)
    t = min(target, max(128, (hw // 128) * 128))
    while t >= 128:
        if hw % t == 0:
            return t, False
        t -= 128
    t = min(target, ((hw + 127) // 128) * 128)
    return t, True


def fa_head_forward(x_nchw, fre_nchw, wx, bx, wf, bf, wp, bp, alpha,
                    *, tile_hw=2048):
    """x_nchw: (B, inter, H, W); fre_nchw: (B, in_ch, H, W). Returns NCHW bf16.

    wx/wf/wp: folded conv+BN weights, shape (Cout, Cin).
    bx/bf/bp: folded BN biases, shape (Cout,).
    Inputs are expected in bf16 (producer-side); f32 inputs are cast here.
    """
    B, Cx, H, W = x_nchw.shape
    Cf = fre_nchw.shape[1]
    HW = H * W
    T, needs_pad = _pick_hw_tile(HW, tile_hw)
    nT = pl.cdiv(HW, T)
    HW_pad = nT * T

    # (B, C, HW): channels on sublanes, HW on lanes — no transpose needed.
    x = x_nchw.reshape(B, Cx, HW)
    f = fre_nchw.reshape(B, Cf, HW)
    if x.dtype != jnp.bfloat16:
        x = x.astype(jnp.bfloat16)   # ideally produced as bf16 upstream
    if f.dtype != jnp.bfloat16:
        f = f.astype(jnp.bfloat16)
    if needs_pad:
        x = jnp.pad(x, ((0, 0), (0, 0), (0, HW_pad - HW)))
        f = jnp.pad(f, ((0, 0), (0, 0), (0, HW_pad - HW)))

    wx_b = jnp.asarray(wx, jnp.bfloat16)
    wf_b = jnp.asarray(wf, jnp.bfloat16)
    wp_b = jnp.asarray(wp, jnp.bfloat16)
    bx_c = jnp.asarray(bx, jnp.float32).reshape(Cx, 1)
    bf_c = jnp.asarray(bf, jnp.float32).reshape(Cx, 1)
    bp_c = jnp.asarray(bp, jnp.float32).reshape(Cx, 1)

    # Split HW across 2 slices so pass 1 fills both v7x TensorCores even when
    # B is small; harmless (one extra tiny partial sum) on 1-TC chips.
    NS = 2 if (nT >= 2 and nT % 2 == 0) else 1
    nTs = nT // NS

    # ---------- pass 1: partial attention logits (B, NS, Cx, Cx) ----------
    att_kernel = functools.partial(
        _fa_att_partial_kernel, tiles_per_split=nTs, tile_hw=T,
        hw_valid=HW, masked=needs_pad)
    w_const1 = lambda b, s, t: (0, 0)
    att_cost = pl.CostEstimate(
        flops=2 * B * HW_pad * (Cx * Cx + Cf * Cx + Cx * Cx),
        transcendentals=0,
        bytes_accessed=B * HW_pad * (Cx + Cf) * 2 + B * NS * Cx * Cx * 4
        + (Cx * Cx + Cx * Cf) * 2 + 2 * Cx * 4)
    att_part = pl.pallas_call(
        att_kernel,
        out_shape=jax.ShapeDtypeStruct((B, NS, Cx, Cx), jnp.float32),
        grid=(B, NS, nTs),
        in_specs=[
            pl.BlockSpec((1, Cx, T), lambda b, s, t: (b, 0, s * nTs + t)),
            pl.BlockSpec((1, Cf, T), lambda b, s, t: (b, 0, s * nTs + t)),
            pl.BlockSpec((Cx, Cx), w_const1),
            pl.BlockSpec((Cx, 1), w_const1),
            pl.BlockSpec((Cx, Cf), w_const1),
            pl.BlockSpec((Cx, 1), w_const1),
        ],
        out_specs=pl.BlockSpec((1, 1, Cx, Cx), lambda b, s, t: (b, s, 0, 0)),
        scratch_shapes=[pltpu.VMEM((Cx, Cx), jnp.float32)],
        compiler_params=pltpu.CompilerParams(
            dimension_semantics=("parallel", "parallel", "arbitrary")),
        cost_estimate=att_cost,
    )(x, f, wx_b, bx_c, wf_b, bf_c)

    # ---- tiny epilogue in XLA: partial-sum, max-shift softmax, fold alpha ----
    att = jnp.sum(att_part, axis=1)                            # (B, Cx, Cx) f32
    att_new = jnp.max(att, axis=-1, keepdims=True) - att
    att_sm = jax.nn.softmax(att_new, axis=-1)
    alpha_f = jnp.asarray(alpha, jnp.float32)
    att_scaled = (alpha_f * att_sm).astype(jnp.bfloat16)       # alpha folded in

    # ---------- pass 2: apply attention + residual + conv_p2 ----------
    w_const2 = lambda b, t: (0, 0)
    apply_cost = pl.CostEstimate(
        flops=2 * B * HW_pad * (3 * Cx * Cx),
        transcendentals=0,
        bytes_accessed=B * HW_pad * Cx * 2 + B * Cx * Cx * 2
        + B * HW_pad * Cx * 2 + 2 * Cx * Cx * 2 + 2 * Cx * 4)
    out = pl.pallas_call(
        _fa_apply_kernel,
        out_shape=jax.ShapeDtypeStruct((B, Cx, HW_pad), jnp.bfloat16),
        grid=(B, nT),
        in_specs=[
            pl.BlockSpec((1, Cx, T), lambda b, t: (b, 0, t)),
            pl.BlockSpec((1, Cx, Cx), lambda b, t: (b, 0, 0)),
            pl.BlockSpec((Cx, Cx), w_const2),
            pl.BlockSpec((Cx, 1), w_const2),
            pl.BlockSpec((Cx, Cx), w_const2),
            pl.BlockSpec((Cx, 1), w_const2),
        ],
        out_specs=pl.BlockSpec((1, Cx, T), lambda b, t: (b, 0, t)),
        compiler_params=pltpu.CompilerParams(
            dimension_semantics=("parallel", "parallel")),
        cost_estimate=apply_cost,
    )(x, att_scaled, wx_b, bx_c, wp_b, bp_c)

    if needs_pad:
        out = out[:, :, :HW]
    return out.reshape(B, Cx, H, W)


def _fold_bn(w_conv, gamma, beta, mean, var, eps=1e-5):
    """Fold eval-mode BN into a bias-free 1x1 conv.  w_conv: (Cout, Cin)."""
    scale = gamma / jnp.sqrt(var + eps)
    return w_conv * scale[:, None], beta - mean * scale


def _ref_forward_nchw(x, fre, WxE, bX, WfE, bF, WpE, bP, alpha):
    """Pure-JAX f32 reference mimicking the PyTorch NCHW semantics (folded BN)."""
    fx = jax.nn.relu(jnp.einsum('oi,bihw->bohw', WxE, x) + bX[None, :, None, None])
    ff = jax.nn.relu(jnp.einsum('oi,bihw->bohw', WfE, fre) + bF[None, :, None, None])
    B, C, H, W = fx.shape
    fa = fx.reshape(B, C, H * W)
    fft = jnp.transpose(ff.reshape(B, C, H * W), (0, 2, 1))
    att = jnp.einsum('bcn,bnd->bcd', fa, fft)
    att_new = jnp.max(att, axis=-1, keepdims=True) - att
    att_sm = jax.nn.softmax(att_new, axis=-1)
    fe = jnp.einsum('bcd,bdn->bcn', att_sm, fa).reshape(B, C, H, W)
    feat_p = alpha * fe + fx
    return jax.nn.relu(jnp.einsum('oi,bihw->bohw', WpE, feat_p) + bP[None, :, None, None])


if __name__ == "__main__":
    # Small deterministic setup: in_ch=8, inter_channels=32, batch=2.
    B, in_ch, inter = 2, 8, 32
    key = jax.random.PRNGKey(0)
    keys = jax.random.split(key, 8)

    # conv_x1 / conv_f1 / conv_p2 params (conv weight + BN gamma/beta/mean/var)
    Wx = 0.05 * jax.random.normal(keys[2], (inter, inter), jnp.float32)
    Wf = 0.05 * jax.random.normal(keys[3], (inter, in_ch), jnp.float32)
    Wp = 0.05 * jax.random.normal(keys[4], (inter, inter), jnp.float32)

    def bn_params(k):
        k1, k2, k3, k4 = jax.random.split(k, 4)
        gamma = 1.0 + 0.1 * jax.random.normal(k1, (inter,), jnp.float32)
        beta = 0.1 * jax.random.normal(k2, (inter,), jnp.float32)
        mean = 0.1 * jax.random.normal(k3, (inter,), jnp.float32)
        var = jnp.abs(jax.random.normal(k4, (inter,), jnp.float32)) + 0.5
        return gamma, beta, mean, var

    gx, bxn, mx, vx = bn_params(keys[5])
    gf, bfn, mf, vf = bn_params(keys[6])
    gp, bpn, mp, vp = bn_params(keys[7])

    # nn.Parameter alpha is zero-init in __init__; use a nonzero deterministic
    # value so the attention branch is exercised.
    alpha = jnp.float32(0.5)

    # TODO(synk): BatchNorm is applied in eval mode (running stats folded into
    # the 1x1 convs); training-mode batch statistics are not implemented.
    wx_k, bx_k = _fold_bn(Wx, gx, bxn, mx, vx)
    wf_k, bf_k = _fold_bn(Wf, gf, bfn, mf, vf)
    wp_k, bp_k = _fold_bn(Wp, gp, bpn, mp, vp)

    q = lambda a: a.astype(jnp.bfloat16).astype(jnp.float32)

    def run_case(H, W, tile_hw):
        kx = jax.random.fold_in(keys[0], H * 1000 + W)
        kf = jax.random.fold_in(keys[1], H * 1000 + W)
        x = jax.random.normal(kx, (B, inter, H, W), jnp.float32)
        fre = jax.random.normal(kf, (B, in_ch, H, W), jnp.float32)

        # Upstream activations are handed over in bf16 (no extra HBM pass).
        out = fa_head_forward(x.astype(jnp.bfloat16), fre.astype(jnp.bfloat16),
                              wx_k, bx_k, wf_k, bf_k, wp_k, bp_k, alpha,
                              tile_hw=tile_hw)
        out = jax.block_until_ready(out)

        # Reference: same math in f32 on the bf16-quantized inputs/weights the
        # kernel actually consumes (kernel keeps f32 accumulation throughout).
        ref = _ref_forward_nchw(q(x), q(fre), q(wx_k), bx_k, q(wf_k), bf_k,
                                q(wp_k), bp_k, alpha)
        np.testing.assert_allclose(np.asarray(out.astype(jnp.float32)),
                                   np.asarray(ref), rtol=2e-2, atol=2e-2)

    # Divisible path: HW=512, T=128 -> 4 tiles, 2-way HW split + accumulation.
    run_case(32, 16, 128)
    # Ragged path: HW=324 -> T=128, padded to 384 with in-kernel tail mask.
    run_case(18, 18, 128)

    print("KERNEL_OK")
</pallas_src>

<mosaic_0001>
module attributes {stable_mosaic.version = 11 : i64} {
  func.func @_fa_att_partial_kernel(%arg0: i32, %arg1: i32, %arg2: i32, %arg3: memref<1x32x128xbf16, #tpu.memory_space<vmem>>, %arg4: memref<1x8x128xbf16, #tpu.memory_space<vmem>>, %arg5: memref<32x32xbf16, #tpu.memory_space<vmem>>, %arg6: memref<32x1xf32, #tpu.memory_space<vmem>>, %arg7: memref<32x8xbf16, #tpu.memory_space<vmem>>, %arg8: memref<32x1xf32, #tpu.memory_space<vmem>>, %arg9: memref<1x1x32x32xf32, #tpu.memory_space<vmem>>, %arg10: memref<32x32xf32, #tpu.memory_space<vmem>>) attributes {dimension_semantics = [#tpu.dimension_semantics<parallel>, #tpu.dimension_semantics<parallel>, #tpu.dimension_semantics<arbitrary>], iteration_bounds = array<i64: 2, 2, 2>, scalar_prefetch = 0 : i64, scratch_operands = 1 : i64, tpu.core_type = #tpu.core_type<tc>, window_params = [{transform_indices = @transform_0, window_bounds = array<i64: 1, 32, 128>}, {transform_indices = @transform_1, window_bounds = array<i64: 1, 8, 128>}, {pipeline_mode = #tpu.pipeline_mode<synchronous>, transform_indices = @transform_2, window_bounds = array<i64: 32, 32>}, {pipeline_mode = #tpu.pipeline_mode<synchronous>, transform_indices = @transform_3, window_bounds = array<i64: 32, 1>}, {pipeline_mode = #tpu.pipeline_mode<synchronous>, transform_indices = @transform_4, window_bounds = array<i64: 32, 8>}, {pipeline_mode = #tpu.pipeline_mode<synchronous>, transform_indices = @transform_5, window_bounds = array<i64: 32, 1>}, {transform_indices = @transform_6, window_bounds = array<i64: 1, 1, 32, 32>}]} {
    %c0_i32 = arith.constant 0 : i32
    %0 = arith.cmpi eq, %arg2, %c0_i32 : i32
    %1 = arith.extui %0 : i1 to i32
    %c0_i32_0 = arith.constant 0 : i32
    %2 = arith.cmpi ne, %1, %c0_i32_0 : i32
    scf.if %2 {
      %cst_23 = arith.constant 0.000000e+00 : f32
      %30 = vector.broadcast %cst_23 : f32 to vector<32x32xf32>
      %c0_24 = arith.constant 0 : index
      %c0_25 = arith.constant 0 : index
      %31 = vector.load %arg10[%c0_24, %c0_25] : memref<32x32xf32, #tpu.memory_space<vmem>>, vector<32x32xf32>
      tpu.vector_store %arg10[%c0_24, %c0_25], %30 {strides = array<i32>} : memref<32x32xf32, #tpu.memory_space<vmem>>, vector<32x32xf32>,
    } else {
    }
    %c0 = arith.constant 0 : index
    %c0_1 = arith.constant 0 : index
    %c0_2 = arith.constant 0 : index
    %3 = vector.load %arg3[%c0, %c0_1, %c0_2] : memref<1x32x128xbf16, #tpu.memory_space<vmem>>, vector<1x32x128xbf16>
    %4 = vector.shape_cast %3 : vector<1x32x128xbf16> to vector<32x128xbf16>
    %c0_3 = arith.constant 0 : index
    %c0_4 = arith.constant 0 : index
    %c0_5 = arith.constant 0 : index
    %5 = vector.load %arg4[%c0_3, %c0_4, %c0_5] : memref<1x8x128xbf16, #tpu.memory_space<vmem>>, vector<1x8x128xbf16>
    %6 = vector.shape_cast %5 : vector<1x8x128xbf16> to vector<8x128xbf16>
    %c0_6 = arith.constant 0 : index
    %c0_7 = arith.constant 0 : index
    %7 = vector.load %arg5[%c0_6, %c0_7] : memref<32x32xbf16, #tpu.memory_space<vmem>>, vector<32x32xbf16>
    %cst = arith.constant dense<0.000000e+00> : vector<32x128xf32>
    %8 = tpu.matmul %7, %4, %cst {dimension_numbers = #tpu.dot_dimension_numbers<[1], [0], [0], [1], [0, 0, 1, 1], [], []>} : vector<32x32xbf16>, vector<32x128xbf16>, vector<32x128xf32> -> vector<32x128xf32>
    %c0_8 = arith.constant 0 : index
    %c0_9 = arith.constant 0 : index
    %9 = vector.load %arg6[%c0_8, %c0_9] : memref<32x1xf32, #tpu.memory_space<vmem>>, vector<32x1xf32>
    %10 = vector.broadcast %9 : vector<32x1xf32> to vector<32x128xf32>
    %11 = arith.addf %8, %10 : vector<32x128xf32>
    %cst_10 = arith.constant 0.000000e+00 : f32
    %12 = vector.broadcast %cst_10 : f32 to vector<32x128xf32>
    %13 = arith.maximumf %11, %12 : vector<32x128xf32>
    %c0_11 = arith.constant 0 : index
    %c0_12 = arith.constant 0 : index
    %14 = vector.load %arg7[%c0_11, %c0_12] : memref<32x8xbf16, #tpu.memory_space<vmem>>, vector<32x8xbf16>
    %cst_13 = arith.constant dense<0.000000e+00> : vector<32x128xf32>
    %15 = tpu.matmul %14, %6, %cst_13 {dimension_numbers = #tpu.dot_dimension_numbers<[1], [0], [0], [1], [0, 0, 1, 1], [], []>} : vector<32x8xbf16>, vector<8x128xbf16>, vector<32x128xf32> -> vector<32x128xf32>
    %c0_14 = arith.constant 0 : index
    %c0_15 = arith.constant 0 : index
    %16 = vector.load %arg8[%c0_14, %c0_15] : memref<32x1xf32, #tpu.memory_space<vmem>>, vector<32x1xf32>
    %17 = vector.broadcast %16 : vector<32x1xf32> to vector<32x128xf32>
    %18 = arith.addf %15, %17 : vector<32x128xf32>
    %cst_16 = arith.constant 0.000000e+00 : f32
    %19 = vector.broadcast %cst_16 : f32 to vector<32x128xf32>
    %20 = arith.maximumf %18, %19 : vector<32x128xf32>
    %c0_17 = arith.constant 0 : index
    %c0_18 = arith.constant 0 : index
    %21 = vector.load %arg10[%c0_17, %c0_18] : memref<32x32xf32, #tpu.memory_space<vmem>>, vector<32x32xf32>
    %22 = arith.truncf %13 : vector<32x128xf32> to vector<32x128xbf16>
    %23 = arith.truncf %20 : vector<32x128xf32> to vector<32x128xbf16>
    %cst_19 = arith.constant dense<0.000000e+00> : vector<32x32xf32>
    %24 = tpu.matmul %22, %23, %cst_19 {dimension_numbers = #tpu.dot_dimension_numbers<[1], [1], [0], [0], [0, 0, 1, 0], [], []>} : vector<32x128xbf16>, vector<32x128xbf16>, vector<32x32xf32> -> vector<32x32xf32>
    %25 = arith.addf %21, %24 : vector<32x32xf32>
    %c0_20 = arith.constant 0 : index
    %c0_21 = arith.constant 0 : index
    %26 = vector.load %arg10[%c0_20, %c0_21] : memref<32x32xf32, #tpu.memory_space<vmem>>, vector<32x32xf32>
    tpu.vector_store %arg10[%c0_20, %c0_21], %25 {strides = array<i32>} : memref<32x32xf32, #tpu.memory_space<vmem>>, vector<32x32xf32>,
    %c1_i32 = arith.constant 1 : i32
    %27 = arith.cmpi eq, %arg2, %c1_i32 : i32
    %28 = arith.extui %27 : i1 to i32
    %c0_i32_22 = arith.constant 0 : i32
    %29 = arith.cmpi ne, %28, %c0_i32_22 : i32
    scf.if %29 {
      %c0_23 = arith.constant 0 : index
      %c0_24 = arith.constant 0 : index
      %30 = vector.load %arg10[%c0_23, %c0_24] : memref<32x32xf32, #tpu.memory_space<vmem>>, vector<32x32xf32>
      %c0_25 = arith.constant 0 : index
      %c0_26 = arith.constant 0 : index
      %c0_27 = arith.constant 0 : index
      %c0_28 = arith.constant 0 : index
      %31 = vector.load %arg9[%c0_25, %c0_26, %c0_27, %c0_28] : memref<1x1x32x32xf32, #tpu.memory_space<vmem>>, vector<1x1x32x32xf32>
      %32 = vector.shape_cast %31 : vector<1x1x32x32xf32> to vector<32x32xf32>
      %33 = vector.shape_cast %30 : vector<32x32xf32> to vector<1x1x32x32xf32>
      tpu.vector_store %arg9[%c0_25, %c0_26, %c0_27, %c0_28], %33 {strides = array<i32>} : memref<1x1x32x32xf32, #tpu.memory_space<vmem>>, vector<1x1x32x32xf32>,
    } else {
    }
    return
  }
  func.func @transform_0(%arg0: i32, %arg1: i32, %arg2: i32) -> (i32, i32, i32) {
    %c2_i32 = arith.constant 2 : i32
    %0 = arith.muli %arg1, %c2_i32 : i32
    %1 = arith.addi %0, %arg2 : i32
    %c0_i32 = arith.constant 0 : i32
    %c0_i32_0 = arith.constant 0 : i32
    return %arg0, %c0_i32, %1 : i32, i32, i32
  }
  func.func @transform_1(%arg0: i32, %arg1: i32, %arg2: i32) -> (i32, i32, i32) {
    %c2_i32 = arith.constant 2 : i32
    %0 = arith.muli %arg1, %c2_i32 : i32
    %1 = arith.addi %0, %arg2 : i32
    %c0_i32 = arith.constant 0 : i32
    %c0_i32_0 = arith.constant 0 : i32
    return %arg0, %c0_i32, %1 : i32, i32, i32
  }
  func.func @transform_2(%arg0: i32, %arg1: i32, %arg2: i32) -> (i32, i32) {
    %c0_i32 = arith.constant 0 : i32
    %c0_i32_0 = arith.constant 0 : i32
    %c0_i32_1 = arith.constant 0 : i32
    return %c0_i32, %c0_i32_0 : i32, i32
  }
  func.func @transform_3(%arg0: i32, %arg1: i32, %arg2: i32) -> (i32, i32) {
    %c0_i32 = arith.constant 0 : i32
    %c0_i32_0 = arith.constant 0 : i32
    %c0_i32_1 = arith.constant 0 : i32
    return %c0_i32, %c0_i32_0 : i32, i32
  }
  func.func @transform_4(%arg0: i32, %arg1: i32, %arg2: i32) -> (i32, i32) {
    %c0_i32 = arith.constant 0 : i32
    %c0_i32_0 = arith.constant 0 : i32
    %c0_i32_1 = arith.constant 0 : i32
    return %c0_i32, %c0_i32_0 : i32, i32
  }
  func.func @transform_5(%arg0: i32, %arg1: i32, %arg2: i32) -> (i32, i32) {
    %c0_i32 = arith.constant 0 : i32
    %c0_i32_0 = arith.constant 0 : i32
    %c0_i32_1 = arith.constant 0 : i32
    return %c0_i32, %c0_i32_0 : i32, i32
  }
  func.func @transform_6(%arg0: i32, %arg1: i32, %arg2: i32) -> (i32, i32, i32, i32) {
    %c0_i32 = arith.constant 0 : i32
    %c0_i32_0 = arith.constant 0 : i32
    %c0_i32_1 = arith.constant 0 : i32
    return %arg0, %arg1, %c0_i32, %c0_i32_0 : i32, i32, i32, i32
  }
}

</mosaic_0001>

<bundles_post_ra>
// kernel: tpu_custom_call.1
= control target key start
LH: loop header
LB: loop body
LE: loop exit
PB: predicated region body
PF: predicated region fallthrough
CT: control target
= control target key end

     0   :  { %s1530_s0 = inlined_call_operand.hbm [shape: bf16[2,32,512], index: 0, kind: input, shape index: {}]   ;;  %s1531_s1 = inlined_call_operand.vmem [shape: bf16[2,8,512], index: 1, kind: input, shape index: {}]   ;;  %s1532_s2 = inlined_call_operand.vmem [shape: bf16[32,32], index: 2, kind: input, shape index: {}]   ;;  %s1533_s3 = inlined_call_operand.vmem [shape: f32[32,1], index: 3, kind: input, shape index: {}]   ;;  %s1534_s4 = inlined_call_operand.vmem [shape: bf16[32,8], index: 4, kind: input, shape index: {}]   ;;  %s1535_s5 = inlined_call_operand.vmem [shape: f32[32,1], index: 5, kind: input, shape index: {}]   ;;  %s1536_s6 = inlined_call_operand.hbm [shape: f32[2,2,32,32], index: 6, kind: output, shape index: {}]  }
   0x1   :  { %1546 = sst [smem:[#allocation16_spill]] %s1533_s3 }
   0x2   :  { %1547 = sst [smem:[#allocation17_spill]] %s1536_s6 }
   0x3   :  { %11 = vsyncpa [#allocation4], 0 }
   0x4   :  { %13 = vsyncpa [#allocation4 + $0x1], 0 }
   0x5   :  { %14 = vsyncpa [#allocation5], 0 }
   0x6   :  { %16 = vsyncpa [#allocation5 + $0x1], 0  ;;  %s1199_s21 = smov 0   ;;  %s1201_s22 = smov 0  }
   0x7   :  { %s1203_s23 = smov 0   ;;  %s1205_s24 = smov 0  }
   0x8   :  { %s1207_s25 = smov 0   ;;  %s1209_s26 = smov 0  }
   0x9   :  { %s1211_s27 = smov 0   ;;  %s1213_s28 = smov 0  }
   0xa   :  { %s1215_s29 = smov 0   ;;  %s1217_s30 = smov 0  }
   0xb   :  { %s1219_s7 = smov 0   ;;  %s1221_s8 = smov 0  }
   0xc   :  { %s1223_s9 = smov 0  }
   0xd LB: > { %1548 = sst [smem:[#allocation9_spill]] %s1141_s30  ;;  %s1537_s10 = sadd.s32 4294967295, %s1153_s9   ;;  %s1153_s9 = sphi %s1223_s9, %s22_s9   ;;  %s1149_s8 = sphi %s1221_s8, %s1582_s8   ;;  %s1145_s7 = sphi %s1219_s7, %s1572_s7   ;;  %s1141_s30 = sphi %s1217_s30, %s1571_s30   ;;  %s1137_s29 = sphi %s1215_s29, %s1581_s29   ;;  %s1133_s28 = sphi %s1213_s28, %s1570_s28   ;;  %s1129_s27 = sphi %s1211_s27, %s1569_s27   ;;  %s1125_s26 = sphi %s1209_s26, %s1580_s26   ;;  %s1121_s25 = sphi %s1207_s25, %s1579_s25   ;;  %s1117_s24 = sphi %s1205_s24, %s1578_s24   ;;  %s1113_s23 = sphi %s1203_s23, %s1577_s23   ;;  %s1109_s22 = sphi %s1201_s22, %s1576_s22   ;;  %s1105_s21 = sphi %s1199_s21, %s1575_s21  }
   0xe   : > { %1549 = sst [smem:[#allocation10_spill]] %s1145_s7  ;;  %s34_s12 = sadd.s32 1, %s1141_s30 }
   0xf   : > { %s37_s13 = sadd.s32 1, %s1145_s7  ;;  %p35_p0 = scmp.ge.s32.totalorder %s34_s12, 2 }
  0x10   : > { %s41_s14 = sadd.s32 1, %s1149_s8  ;;  %s784_s15 = sshll.u32 %s1145_s7, 1 }
  0x11   : > { %s54_s16 = sadd.s32 1, %s1125_s26  ;;  %s1584_s12 = smov (%p35_p0, %s34_s12), 0 }
  0x12   : > { %1550 = sst [smem:[#allocation11_spill]] %s1584_s12  ;;  %s1586_s13 = smov (!%p35_p0, %s37_s13), %s1145_s7 }
  0x13   : > { %s1275_s17 = sadd.s32 %s1141_s30, %s784_s15  ;;  %p61_p1 = scmp.ne.s32.totalorder %s1125_s26, %s1121_s25 }
  0x14   : > { %p39_p2 = scmp.ge.s32.totalorder %s1586_s13, 2  ;;  %p62_p3 = scmp.eq.s32.totalorder %s1153_s9, 0 }
  0x15   : > { %p67_p4 = scmp.ne.s32.totalorder %s1121_s25, %s1117_s24  ;;  %p68_p5 = scmp.eq.s32.totalorder %s1537_s10, 0 }
  0x16   : > { %s1588_s13 = smov (%p39_p2, %s1586_s13), 0  ;;  %s1590_s14 = smov (!%p39_p2, %s41_s14), %s1149_s8 }
  0x17   : > { %1551 = sst [smem:[#allocation12_spill]] %s1588_s13  ;;  %s785_s18 = sshll.u32 %s1588_s13, 1 }
  0x18   : > { %p1288_p6 = por %p62_p3, %p61_p1  ;;  %p43_p7 = scmp.ge.s32.totalorder %s1590_s14, 2 }
  0x19   : > { %s48_s20 = sadd.s32 %s785_s18, %s1584_s12  ;;  %p1294_p8 = por %p68_p5, %p67_p4 }
  0x1a   : > { %s50_s24 = ssub.s32 %s1275_s17, %s48_s20  ;;  %s1592_s14 = smov (%p43_p7, %s1590_s14), 0 }
  0x1b   : > { %1554 = sst [smem:[#allocation13_spill]] %s1592_s14  ;;  %s194_s11 = ssub.s32 %s1145_s7, %s1588_s13 }
  0x1c   : > { %s198_s10 = sadd.s32 1, %s1113_s23  ;;  %s49_s30 = ssub.s32 %s1149_s8, %s1592_s14 }
  0x1d   : > { %p208_p9 = scmp.ne.s32.totalorder %s1113_s23, %s1109_s22  ;;  %s51_s6 = sor.u32 %s50_s24, %s49_s30 }
  0x1e   : > { %s195_s3 = sor.u32 %s194_s11, %s49_s30  ;;  %p52_p10 = scmp.eq.s32.totalorder %s51_s6, 0 }
  0x1f   : > { %p196_p11 = scmp.eq.s32.totalorder %s195_s3, 0  ;;  %s1555_s18 = sadd.s32 4294967295, %s1153_s9  }
  0x20   : > { %p209_p12 = scmp.eq.s32.totalorder %s1555_s18, 7  ;;  %p214_p13 = scmp.ne.s32.totalorder %s1109_s22, %s1105_s21 }
  0x21   : > { %s1312_s20 = scalar_select %p52_p10, %s1125_s26, %s54_s16  }
  0x22   : > { %s1315_s12 = scalar_select %p196_p11, %s1113_s23, %s198_s10  }
  0x23   : > { %1556 = sst [smem:[#allocation14_spill]] %s1312_s20  ;;  %p1317_p0 = por %p209_p12, %p208_p9 }
  0x24   : > { %1557 = sst [smem:[#allocation15_spill]] %s1315_s12  ;;  %s1559_s14 = sadd.s32 4294967294, %s1153_s9  }
  0x25   : > { %s1558_s13 = scalar_select %p1317_p0, 1, 0 }
  0x26   : > { %p215_p1 = scmp.eq.s32.totalorder %s1559_s14, 7  ;;  %p864_p2 = scmp.lt.s32.totalorder %s1153_s9, 8 }
  0x27   : > { %s247_s3 = sand.u32 1, %s1125_s26   ;;  %s792_s30 = sshll.u32 %s1149_s8, 4 }
  0x28   : > { %p1324_p3 = por %p215_p1, %p214_p13  ;;  %s790_s6 = sshll.u32 %s247_s3, 4 }
  0x29   : > { %s258_s11 = sadd.s32 %s792_s30, %s1275_s17  ;;  %s251_s18 = scalar_lea.vmem [#allocation3], %s790_s6 }
  0x2a   : > { %s1560_s24 = scalar_select %p1324_p3, 1, 0 }
  0x2b   : > { %s261_s16 = sshll.u32 %s251_s18, 4  ;;  %s793_s7 = sshll.u32 %s258_s11, 6  ;;  %s1331_s16 = int_to_ptr.vmem [resolvable:$true] %s261_s16 }
  0x2c   : > { %s1336_s12 = scalar_lea.hbm %s1530_s0, %s793_s7  ;;  %p1340_p4 = pnand %p864_p2, %p1288_p6 }
  0x2d   : > { %s1344_s17 = scalar_lea.sflag [#allocation4], %s247_s3  ;;  %s985_s6 = scalar_lea.hbm %s1336_s12, 256 }
  0x2e   : > { %p986_p5 = scmp.ne.s32.totalorder %s1336_s12, %s985_s6  ;;  %p987_p7 = pneg %p1340_p4 }
  0x2f   : > { %s990_s20 = scalar_lea.hbm %s1530_s0, 2048  ;;  %p991_p6 = scmp.lt.u32.totalorder %s1336_s12, %s1530_s0 }
  0x30   : > { %p988_p9 = pnand %p987_p7, %p986_p5  ;;  %p992_p11 = scmp.lt.u32.totalorder %s990_s20, %s985_s6 }
  0x31   : > { %p994_p13 = scmp.lt.u32.totalorder %s985_s6, %s1336_s12 }
  0x32   : > { %p989_p10 = pneg %p988_p9  ;;  %p993_p12 = por %p992_p11, %p991_p6 }
  0x34   : > { %p995_p1 = por %p994_p13, %p993_p12 }
  0x36   : > { %p996_p2 = pnand %p995_p1, %p989_p10 }
  0x38   : > { %999 = shalt.err (!%p996_p2)
}
  0x39   : > { %s1000_s3 = scalar_lea.vmem %s1331_s16, 256  ;;  %s1155_s18 = smov [#allocation3]  }
  0x3a   : > { %p1001_p5 = scmp.ne.s32.totalorder %s1331_s16, %s1000_s3  ;;  %s1005_s10 = sshll.u32 %s1155_s18, 4  ;;  %s1006_s10 = int_to_ptr.vmem [resolvable:$false] %s1005_s10 }
  0x3b   : > { %s1007_s7 = scalar_lea.vmem %s1006_s10, 512  ;;  %p1008_p0 = scmp.lt.s32.totalorder %s1331_s16, %s1006_s10 }
  0x3c   : > { %p1003_p9 = pnand %p1001_p5, %p987_p7  ;;  %p1009_p6 = scmp.lt.s32.totalorder %s1007_s7, %s1000_s3 }
  0x3e   : > { %p1004_p3 = pneg %p1003_p9  ;;  %p1010_p11 = por %p1009_p6, %p1008_p0 }
  0x40   : > { %p1011_p12 = pnand %p1010_p11, %p1004_p3 }
  0x42   : > { %1014 = shalt.err (!%p1011_p12)
}
  0x43   : > { %s1156_s6 = smov 256   ;;  %s1157_s19 = smov 64  }
  0x44   : > { %s1158_s20 = smov 4   ;;  %p794_p7 = scmp.ge.s32.totalorder %s1153_s9, 1 }
  0x45   : > { %859 = dma.hbm_to_vmem [thread:$0]  (!%p1340_p4), %s1336_s12, 256, %s1331_s16, %s1344_s17, %s1156_s6, %s1157_s19, %s1158_s20  }
  0x46   : > { %p284_p10 = scmp.lt.s32.totalorder %s1153_s9, 9 }
  0x48   : > { %p285_p13 = pnand %p794_p7, %p284_p10 }
  0x49   : > { %s290_s30 = sand.u32 (!%p285_p13), 1, %s1121_s25  }
  0x4a   : > { %288 = sbr.rel (%p285_p13) target bundleno = 603 (0x25b), region = 44  ;;  %s795_s11 = sshll.u32 (!%p285_p13), %s290_s30, 4 }
  0x4b   : > { %s291_s3 = scalar_lea.sflag (!%p285_p13), [#allocation4], %s290_s30  ;;  %s294_s18 = scalar_lea.vmem (!%p285_p13), [#allocation3], %s795_s11 }
  0x51   : > { %1096 = dma.done.wait (%p1294_p8), %s291_s3, 256  }
  0x52   : > { %1098 = vsyncadd (%p1294_p8), %s291_s3, 4294967040  ;;  %s330_s12 = sand.u32 1, %s1109_s22   ;;  %s797_s16 = sshll.u32 %s1133_s28, 1 }
  0x53   : > { %s796_s14 = sshll.u32 %s330_s12, 5  ;;  %s336_s17 = sadd.s32 %s1129_s27, %s797_s16 }
  0x54   : > { %p337_p0 = scmp.lt.s32.totalorder %s1137_s29, 1  ;;  %p339_p3 = scmp.lt.s32.totalorder %s336_s17, 3 }
  0x55   : > { %s1389_s11 = scalar_lea.vmem [#allocation6], %s796_s14  ;;  %p800_p8 = scmp.ne.s32.totalorder %s1129_s27, 0 }
  0x56   : > { %s338_s10 = scalar_select %p337_p0, %s1137_s29, 1 }
  0x57   : > { %s1594_s17 = smov (!%p339_p3, %s336_s17), 3  ;;  %351 = sbr.rel (%p800_p8) target bundleno = 94 (0x5e), region = 52 }
  0x58   : > { %s798_s7 = sshll.u32 %s338_s10, 2  ;;  %vm352_vm0 = vcmask (!%p800_p8), 261120   ;;  %v1159_v0 = vmov (!%p800_p8), 0.0  }
  0x59   : > { %s342_s6 = sadd.s32 %s798_s7, %s1594_s17  ;;  %353 = vst.msk [vmem:[#allocation2] sm:$0xff] (!%p800_p8), %vm352_vm0, %v1159_v0  ;;  %354 = vst.msk [vmem:[#allocation2 + $0x8] sm:$0xff] (!%p800_p8), %vm352_vm0, %v1159_v0 }
  0x5a   : > { %s799_s19 = sshll.u32 %s342_s6, 2  ;;  %355 = vst.msk [vmem:[#allocation2 + $0x10] sm:$0xff] (!%p800_p8), %vm352_vm0, %v1159_v0  ;;  %356 = vst.msk [vmem:[#allocation2 + $0x18] sm:$0xff] (!%p800_p8), %vm352_vm0, %v1159_v0 }
  0x5b   : > { %s344_s30 = scalar_lea.vmem %s1531_s1, %s799_s19 }
  0x5e PF: > { %v979_v1 = vld [vmem:[%s294_s18] sm:$0xff]   ;;  %v980_v2 = vld [vmem:[%s294_s18 + $0x8] sm:$0xff]   ;;  %vm412_vm1 = vcmask 261120   ;;  %vm517_vm2 = vcmask 1043456   ;;  %v1160_v5 = vmov 0   ;;  %vm510_vm3 = vcmask 64512  }
  0x5f   : > { %829 = vmatprep.subr.bf16.mxu0 %v979_v1  ;;  %v981_v3 = vld [vmem:[%s1532_s2] sm:$0xff]   ;;  %977 = vset.pattern.permute.xlu0 %v1160_v5  ;;  %v982_v6 = vld [vmem:[%s1532_s2 + $0x8] sm:$0xff]   ;;  %v478_v8 = vld [vmem:[%s1535_s5 + $0x10] sm:$0xff]  ;;  %s1562_s18 = sld [smem:[#allocation16_spill]]  ;;  %p811_p4 = scmp.ne.s32.totalorder %s1129_s27, 1 }
  0x60   : > { %830 = vmatpush3.bf16.msra.mxu0 %v979_v1  ;;  %833 = vmatprep.mubr.msk.bf16.mxu0 %vm412_vm1, %v981_v3  ;;  %v361_v4 = vld [vmem:[%s344_s30] sm:$0xf]  ;;  %v477_v11 = vld [vmem:[%s1535_s5 + $0x8] sm:$0xff]  ;;  %v479_v12 = vld [vmem:[%s1535_s5 + $0x18] sm:$0xff] }
  0x61   : > { %831 = vmatprep.subr.bf16.mxu0 %v980_v2  ;;  %978 = vset.pattern.permute.xlu1 %v1160_v5  ;;  %v476_v7 = vld [vmem:[%s1535_s5] sm:$0xff]  ;;  %v519_v10 = vsel %vm517_vm2, %v361_v4, 0  ;;  %v984_v15 = vld [vmem:[%s1534_s4 + $0x8] sm:$0xff]   ;;  %v576_v54 = vld [vmem:[#allocation2 + $0x10] sm:$0xff] }
  0x62   : > { %v983_v9 = vld [vmem:[%s1534_s4] sm:$0xff]   ;;  %482 = vperm.xlu0 %977, %v476_v7   ;;  %492 = vperm.xlu1 %978, %v478_v8   ;;  %v577_v57 = vld [vmem:[#allocation2 + $0x18] sm:$0xff]  ;;  %v575_v60 = vld [vmem:[#allocation2 + $0x8] sm:$0xff] }
  0x63   : > { %v574_v55 = vld [vmem:[#allocation2] sm:$0xff] }
  0x64   : > { %832 = vmatpush3.bf16.msra.mxu0 %v980_v2 }
  0x65   : > { %851 = vmatprep.subr.msk.bf16.mxu0 %vm517_vm2, %v361_v4  ;;  %v366_v13 = vld [vmem:[%s1562_s18] sm:$0xff]  ;;  %v367_v14 = vld [vmem:[%s1562_s18 + $0x8] sm:$0xff]  ;;  %v368_v16 = vld [vmem:[%s1562_s18 + $0x10] sm:$0xff] }
  0x66   : > { %487 = vperm.xlu0 %977, %v477_v11   ;;  %497 = vperm.xlu1 %978, %v479_v12   ;;  %v369_v17 = vld [vmem:[%s1562_s18 + $0x18] sm:$0xff] }
  0x67   : > { %834 = vmatmul.mubr.msk.bf16.vlgmr.msra.gmra.mrb[0].mxu0 %vm412_vm1, %v982_v6 }
  0x68   : > { %838 = vmatpush3.bf16.msra.mxu0 %v519_v10  ;;  %839 = vmatprep.mubr.msk.bf16.mxu0 %vm510_vm3, %v983_v9 }
  0x6a   : > { %372 = vperm.xlu0 %977, %v366_v13   ;;  %377 = vperm.xlu1 %978, %v367_v14  }
  0x6e   : > { %382 = vperm.xlu0 %977, %v368_v16   ;;  %387 = vperm.xlu1 %978, %v369_v17  }
  0x6f   : > { %840 = vmatmul.mubr.msk.bf16.vlgmr.msra.gmra.mrb[4].mxu0 %vm510_vm3, %v984_v15 }
  0xe1   : > { %v483_v18 = vpop.permute.xlu0 %482  ;;  %v493_v19 = vpop.permute.xlu1 %492 }
  0xe5   : > { %v488_v20 = vpop.permute.xlu0 %487  ;;  %v498_v21 = vpop.permute.xlu1 %497 }
  0xe9   : > { %v373_v22 = vpop.permute.xlu0 %372  ;;  %v378_v23 = vpop.permute.xlu1 %377 }
  0xed   : > { %v383_v24 = vpop.permute.xlu0 %382  ;;  %v388_v26 = vpop.permute.xlu1 %387 }
 0x13a   : > { %v835_v25 = vpop.f32.mrb[0].mxu0 }
 0x13b   : > { %v462_v27 = vadd.f32 %v835_v25, %v383_v24  ;;  %v453_v28 = vpop.f32.mrb[1].mxu0 }
 0x13c   : > { %v454_v29 = vadd.f32 %v453_v28, %v373_v22  ;;  %v836_v30 = vpop.f32.mrb[2].mxu0 }
 0x13d   : > { %v465_v31 = vadd.f32 %v836_v30, %v388_v26  ;;  %v456_v32 = vpop.f32.mrb[3].mxu0  ;;  %v470_v34 = vmax.f32 %v462_v27, 0.0 }
 0x13e   : > { %v457_v33 = vadd.f32 %v456_v32, %v378_v23  ;;  %v468_v36 = vmax.f32 %v454_v29, 0.0 }
 0x13f   : > { %v471_v35 = vmax.f32 %v465_v31, 0.0 }
 0x140   : > { %v469_v37 = vmax.f32 %v457_v33, 0.0 }
 0x141   : > { %v579_v38 = vpack.c.bf16 %v471_v35, %v470_v34 }
 0x142   : > { %v841_v39 = vpop.f32.mrb[4].mxu0  ;;  %v578_v40 = vpack.c.bf16 %v469_v37, %v468_v36 }
 0x143   : > { %v564_v41 = vadd.f32 %v841_v39, %v493_v19  ;;  %v555_v42 = vpop.f32.mrb[5].mxu0 }
 0x144   : > { %v556_v43 = vadd.f32 %v555_v42, %v483_v18  ;;  %v842_v44 = vpop.f32.mrb[6].mxu0  ;;  %847 = vmatprep.mubr.bf16.mxu1 %v578_v40 }
 0x145   : > { %v567_v45 = vadd.f32 %v842_v44, %v498_v21  ;;  %v558_v46 = vpop.f32.mrb[7].mxu0  ;;  %v572_v48 = vmax.f32 %v564_v41, 0.0 }
 0x146   : > { %v559_v47 = vadd.f32 %v558_v46, %v488_v20  ;;  %v570_v50 = vmax.f32 %v556_v43, 0.0 }
 0x147   : > { %v573_v49 = vmax.f32 %v567_v45, 0.0 }
 0x148   : > { %v571_v51 = vmax.f32 %v559_v47, 0.0 }
 0x149   : > { %v581_v52 = vpack.c.bf16 %v573_v49, %v572_v48 }
 0x14a   : > { %v580_v53 = vpack.c.bf16 %v571_v51, %v570_v50 }
 0x14c   : > { %843 = vmatprep.subr.bf16.mxu1 %v580_v53 }
 0x14d   : > { %844 = vmatpush3.bf16.xpose.msra.mxu1 %v580_v53 }
 0x14e   : > { %845 = vmatprep.subr.bf16.mxu1 %v581_v52 }
 0x155   : > { %846 = vmatpush3.bf16.xpose.msra.mxu1 %v581_v52 }
 0x15c   : > { %848 = vmatmul.mubr.bf16.vlgmr.msra.gmra.mrb[0].mxu1 %v579_v38 }
 0x22f   : > { %v849_v56 = vpop.f32.mrb[0].mxu1  ;;  %642 = sbr.rel (%p811_p4) target bundleno = 574 (0x23e), region = 56 }
 0x230   : > { %v633_v58 = vadd.f32 %v849_v56, %v576_v54  ;;  %v616_v59 = vpop.f32.mrb[1].mxu1 }
 0x231   : > { %v631_v61 = vadd.f32 %v616_v59, %v574_v55  ;;  %v850_v62 = vpop.f32.mrb[2].mxu1 }
 0x232   : > { %637 = vst.msk [vmem:[#allocation2 + $0x10] sm:$0xff] %vm412_vm1, %v633_v58  ;;  %v634_v63 = vadd.f32 %v850_v62, %v577_v57  ;;  %v619_v0 = vpop.f32.mrb[3].mxu1 }
 0x233   : > { %635 = vst.msk [vmem:[#allocation2] sm:$0xff] %vm412_vm1, %v631_v61  ;;  %v632_v1 = vadd.f32 %v619_v0, %v575_v60 }
 0x234   : > { %638 = vst.msk [vmem:[#allocation2 + $0x18] sm:$0xff] %vm412_vm1, %v634_v63 }
 0x235   : > { %636 = vst.msk [vmem:[#allocation2 + $0x8] sm:$0xff] %vm412_vm1, %v632_v1 }
 0x239   : > { %v645_v4 = vld [vmem:[#allocation2 + $0x10] sm:$0xff] }
 0x23a   : > { %v643_v2 = vld [vmem:[#allocation2] sm:$0xff]  ;;  %649 = vst.msk [vmem:[%s1389_s11 + $0x10] sm:$0xff] %vm412_vm1, %v645_v4 }
 0x23b   : > { %647 = vst.msk [vmem:[%s1389_s11] sm:$0xff] %vm412_vm1, %v643_v2  ;;  %v646_v5 = vld [vmem:[#allocation2 + $0x18] sm:$0xff] }
 0x23c   : > { %v644_v3 = vld [vmem:[#allocation2 + $0x8] sm:$0xff]  ;;  %650 = vst.msk [vmem:[%s1389_s11 + $0x18] sm:$0xff] %vm412_vm1, %v646_v5 }
 0x23d   : > { %648 = vst.msk [vmem:[%s1389_s11 + $0x8] sm:$0xff] %vm412_vm1, %v644_v3 }
 0x23e PF: > { %s813_s27 = sshll.u32 %s1133_s28, 2  ;;  %s814_s16 = sshll.u32 %s1137_s29, 3 }
 0x23f   : > { %s667_s14 = sshll.u32 %s1389_s11, 4  ;;  %s664_s17 = sadd.s32 %s814_s16, %s813_s27  ;;  %s1448_s14 = int_to_ptr.vmem [resolvable:$true] %s667_s14 }
 0x240   : > { %s815_s10 = sshll.u32 %s664_s17, 7  ;;  %s1563_s19 = sld [smem:[#allocation17_spill]] }
 0x241   : > { %s1457_s20 = scalar_lea.sflag [#allocation5], %s330_s12  ;;  %s1015_s30 = scalar_lea.vmem %s1448_s14, 512 }
 0x242   : > { %p1016_p1 = scmp.ne.s32.totalorder %s1448_s14, %s1015_s30  ;;  %p1564_p2 = scmp.ne.s32.totalorder %s1558_s13, 0 }
 0x243   : > { %s1161_s28 = smov [#allocation6]  }
 0x244   : > { %p1017_p5 = pnand %p1016_p1, %p1564_p2  ;;  %s1019_s29 = sshll.u32 %s1161_s28, 4  ;;  %s1020_s29 = int_to_ptr.vmem [resolvable:$false] %s1019_s29 }
 0x245   : > { %s1021_s11 = scalar_lea.vmem %s1020_s29, 1024  ;;  %p1022_p6 = scmp.lt.s32.totalorder %s1448_s14, %s1020_s29 }
 0x246   : > { %s1453_s15 = scalar_lea.hbm %s1563_s19, %s815_s10  ;;  %p1018_p9 = pneg %p1017_p5 }
 0x247   : > { %p1023_p11 = scmp.lt.s32.totalorder %s1021_s11, %s1015_s30 }
 0x249   : > { %p1024_p12 = por %p1023_p11, %p1022_p6 }
 0x24b   : > { %p1025_p7 = pnand %p1024_p12, %p1018_p9 }
 0x24d   : > { %1028 = shalt.err (!%p1025_p7)
}
 0x24e   : > { %s1029_s12 = scalar_lea.hbm %s1453_s15, 512  ;;  %s1033_s16 = scalar_lea.hbm %s1563_s19, 2048 }
 0x24f   : > { %p1030_p10 = scmp.ne.s32.totalorder %s1453_s15, %s1029_s12  ;;  %p1034_p3 = scmp.lt.u32.totalorder %s1453_s15, %s1563_s19 }
 0x250   : > { %p1035_p8 = scmp.lt.u32.totalorder %s1033_s16, %s1029_s12  ;;  %p1037_p1 = scmp.lt.u32.totalorder %s1029_s12, %s1453_s15 }
 0x251   : > { %p1031_p13 = pnand %p1030_p10, %p1564_p2 }
 0x252   : > { %p1036_p4 = por %p1035_p8, %p1034_p3 }
 0x253   : > { %p1032_p0 = pneg %p1031_p13 }
 0x254   : > { %p1038_p5 = por %p1037_p1, %p1036_p4 }
 0x256   : > { %p1039_p9 = pnand %p1038_p5, %p1032_p0 }
 0x258   : > { %1042 = shalt.err (!%p1039_p9)
}
 0x259   : > { %s1162_s7 = smov 128   ;;  %s1163_s6 = smov 8  }
 0x25a   : > { %854 = dma.vmem_to_hbm [thread:$0]  (%p1564_p2), %s1448_s14, 512, %s1453_s15, %s1457_s20, %s1162_s7, %s1162_s7, %s1163_s6  }
 0x25b PF: > { %p865_p6 = scmp.ge.s32.totalorder %s1153_s9, 2  ;;  %s682_s30 = sand.u32 1, %s1105_s21  }
 0x25c   : > { %p1565_p11 = scmp.ne.s32.totalorder %s1560_s24, 0  ;;  %s683_s28 = scalar_lea.sflag [#allocation5], %s682_s30 }
 0x25e   : > { %p861_p12 = pnand %p865_p6, %p1565_p11 }
 0x260   : > { %1100 = dma.done.wait (!%p861_p12), %s683_s28, 512  }
 0x261   : > { %1102 = vsyncadd (!%p861_p12), %s683_s28, 4294966784  ;;  %s22_s9 = sadd.s32 1, %s1153_s9   ;;  %s1567_s13 = sld [smem:[#allocation15_spill]] }
 0x262   : > { %p1486_p7 = scmp.ge.s32.totalorder %s22_s9, 10   ;;  %s1568_s14 = sld [smem:[#allocation14_spill]] }
 0x263   : > { %s1569_s27 = sld [smem:[#allocation9_spill]]  ;;  %s1570_s28 = sld [smem:[#allocation10_spill]] }
 0x264   : > { %s1571_s30 = sld [smem:[#allocation11_spill]]  ;;  %s1572_s7 = sld [smem:[#allocation12_spill]] }
 0x265   : > { %s1573_s15 = sld [smem:[#allocation13_spill]]  ;;  %s1575_s21 = smov %s1109_s22 }
 0x266   : > { %s1576_s22 = smov %s1113_s23  ;;  %s1578_s24 = smov %s1121_s25 }
 0x267   : > { %s1577_s23 = smov %s1567_s13  ;;  %s1579_s25 = smov %s1125_s26 }
 0x268   : > { %s1580_s26 = smov %s1568_s14  ;;  %s1581_s29 = smov %s1149_s8 }
 0x269   :  { %21 = sbr.rel (!%p1486_p7) target bundleno = 13 (0xd), region = 100 }
 0x26b   : > { %s1582_s8 = smov %s1573_s15 }
 0x270   :  { %688 = vsyncpa [#allocation4], 1 }
 0x271   :  { %690 = vsyncpa [#allocation4 + $0x1], 1 }
 0x272   :  { %691 = vsyncpa [#allocation5], 1 }
 0x273   :  { %693 = vsyncpa [#allocation5 + $0x1], 1 }

</bundles_post_ra>
